<compile_context>
chip_gen: v7x
topology: tpu7x:2x2x1
jax: 0.10.0
libtpu: 0.0.40
codegen_flags: <defaults>
</compile_context>

<pallas_src>
import jax
import jax.numpy as jnp
from jax import lax
from jax.experimental import pallas as pl
from jax.experimental.pallas import tpu as pltpu


# ---------------------------------------------------------------------------
# helpers: generation-aware config, tiny-vector padding
# ---------------------------------------------------------------------------
def _round_up(v, mult):
    return (v + mult - 1) // mult * mult


def _vmem_capacity_bytes():
    try:
        cap = getattr(pltpu.get_tpu_info(), "vmem_capacity_bytes", None)
        if cap:
            return int(cap)
    except Exception:
        pass
    return 64 * 1024 * 1024  # conservative (v7x-sized) fallback


def _hw_config(m_dtype):
    """Pick (max_tn, max_tm, vmem_limit) for this TPU generation / M dtype."""
    itemsize = jnp.dtype(m_dtype).itemsize
    cap = _vmem_capacity_bytes()
    if cap >= 100 * 1024 * 1024:               # v5e / v6e: 128 MiB VMEM
        vmem_limit = 96 * 1024 * 1024
        tn, tm = (2048, 4096) if itemsize <= 2 else (2048, 2048)
    else:                                       # v7x: 64 MiB VMEM
        vmem_limit = 48 * 1024 * 1024
        tn, tm = (2048, 2048) if itemsize <= 2 else (1024, 2048)
    return tn, tm, vmem_limit


def _pad_row(v, size):
    """1-D vector -> zero-padded lane-dense (1, size) f32 row (O(len) cost)."""
    v = v.astype(jnp.float32)
    if v.shape[0] != size:
        v = jnp.pad(v, (0, size - v.shape[0]))
    return v.reshape(1, size)


# ---------------------------------------------------------------------------
# fused kernel: one pass over M -> linear_factor, MTalpha (per-core partials)
# ---------------------------------------------------------------------------
def dual_projection_fused(M, x, alpha, *, max_tn=None, max_tm=None,
                          n_splits=2, vmem_limit_bytes=None):
    """Returns (linear_factor, MTalpha, loss) with f32 accumulation."""
    n, m = M.shape
    auto_tn, auto_tm, auto_vmem = _hw_config(M.dtype)
    max_tn = auto_tn if max_tn is None else max_tn
    max_tm = auto_tm if max_tm is None else max_tm
    vmem_limit = auto_vmem if vmem_limit_bytes is None else vmem_limit_bytes
    assert max_tn % 128 == 0 and max_tm % 128 == 0, "tile caps must be *128"

    # n is 128-aligned too: TN is also the lane dim of the alpha / lf rows.
    TN = min(max_tn, _round_up(n, 128))
    TM = min(max_tm, _round_up(m, 128))
    n_tiles = pl.cdiv(n, TN)
    m_tiles = pl.cdiv(m, TM)

    # Split the n-tile range across cores (leading "parallel" axis). On 1-TC
    # chips the two halves just run sequentially with negligible overhead.
    C = max(1, min(int(n_splits), n_tiles))
    TPC = pl.cdiv(n_tiles, C)                   # n-tiles per core
    n_padl = C * TPC * TN                       # lf output lane extent
    m_padm = m_tiles * TM                       # mta output lane extent (per core)

    # Masking is only emitted for genuinely ragged / overflowing dimensions.
    need_row_mask = (n_padl != n)
    need_col_mask = (m_padm != m)

    xp = _pad_row(x, m_padm)                    # (1, m_padm) f32, zeros beyond m
    ap = _pad_row(alpha, n_padl)                # (1, n_padl) f32, zeros beyond n

    def kernel(x_ref, a_ref, m_ref, lf_ref, mta_ref, mta_acc):
        c = pl.program_id(0)                    # core split index
        gi = pl.program_id(1)                   # n-tile index within this core
        gj = pl.program_id(2)                   # m-tile index (lf reduction axis)

        m_blk = m_ref[...]                      # (TN, TM) in M's dtype
        if need_row_mask or need_col_mask:
            # Zero out-of-range rows/cols of the edge (or clamped-duplicate)
            # tile; select (not multiply) so arbitrary garbage (even NaN) in
            # the OOB region of a partial block cannot leak into results.
            ok = None
            if need_row_mask:
                row_start = (c * TPC + gi) * TN          # unclamped global row
                rows = lax.broadcasted_iota(jnp.int32, (TN, 1), 0) + row_start
                ok = rows < n
            if need_col_mask:
                cols = lax.broadcasted_iota(jnp.int32, (1, TM), 1) + gj * TM
                cok = cols < m
                ok = cok if ok is None else (ok & cok)
            m_blk = jnp.where(ok, m_blk, jnp.zeros_like(m_blk))

        x_blk = x_ref[...].astype(m_blk.dtype)  # (1, TM)
        a_blk = a_ref[...].astype(m_blk.dtype)  # (1, TN)

        # linear_factor tile: resident f32 output block, reduced over gj
        # (innermost axis); "- ones(n)" folded into the init.
        @pl.when(gj == 0)
        def _init_lf():
            lf_ref[...] = jnp.full(lf_ref.shape, -1.0, jnp.float32)

        # (1, TM) . (TN, TM)^T -> (1, TN) without materializing a transpose.
        lf_ref[...] += lax.dot_general(
            x_blk, m_blk,
            dimension_numbers=(((1,), (1,)), ((), ())),
            preferred_element_type=jnp.float32)

        # MTalpha tile: accumulated across gi in a lane-dense f32 VMEM scratch
        # row; only the final gi pass writes the output block (no per-step
        # copy of partial sums).
        contrib = jnp.dot(a_blk, m_blk, preferred_element_type=jnp.float32)

        @pl.when(gi == 0)
        def _mta_init():
            mta_acc[pl.ds(gj, 1), :] = contrib

        @pl.when(gi > 0)
        def _mta_add():
            mta_acc[pl.ds(gj, 1), :] += contrib

        @pl.when(gi == pl.num_programs(1) - 1)
        def _mta_out():
            mta_ref[...] = mta_acc[pl.ds(gj, 1), :]

    lf_out, mta_out = pl.pallas_call(
        kernel,
        out_shape=(
            jax.ShapeDtypeStruct((1, n_padl), jnp.float32),       # linear_factor
            jax.ShapeDtypeStruct((1, C * m_padm), jnp.float32),    # per-core MTalpha
        ),
        grid=(C, TPC, m_tiles),
        in_specs=[
            pl.BlockSpec((1, TM), lambda c, gi, gj: (0, gj)),                  # x
            pl.BlockSpec((1, TN), lambda c, gi, gj: (0, c * TPC + gi)),        # alpha
            # Clamp the M row-block for overflow iterations of an uneven core
            # split; the row mask (computed from the unclamped index) zeroes
            # that duplicate block's contribution.
            pl.BlockSpec(
                (TN, TM),
                lambda c, gi, gj: (jnp.minimum(c * TPC + gi, n_tiles - 1), gj)),
        ],
        out_specs=(
            pl.BlockSpec((1, TN), lambda c, gi, gj: (0, c * TPC + gi)),        # lf
            pl.BlockSpec((1, TM), lambda c, gi, gj: (0, c * m_tiles + gj)),    # mta
        ),
        scratch_shapes=[pltpu.VMEM((m_tiles, TM), jnp.float32)],   # MTalpha accum
        compiler_params=pltpu.CompilerParams(
            dimension_semantics=("parallel", "arbitrary", "arbitrary"),
            vmem_limit_bytes=vmem_limit),
    )(xp, ap, M)

    lf = lf_out[0, :n]
    mta = mta_out.reshape(C, m_padm)
    mta = (mta.sum(axis=0) if C > 1 else mta[0])[:m]
    # O(n+m) loss reduction in plain XLA (negligible vs. streaming M), f32.
    loss = jnp.sum(mta * mta) + 4.0 * jnp.dot(lf, alpha.astype(jnp.float32))
    return lf, mta, loss


# ---------------------------------------------------------------------------
# thin module-style wrapper mirroring the PyTorch API
# ---------------------------------------------------------------------------
class DualProjection:
    def __init__(self, M, alpha=None, key=None):
        self.M = M
        self.n, self.m = M.shape
        if alpha is None:
            key = jax.random.PRNGKey(0) if key is None else key
            alpha = jax.random.normal(key, (self.n,), dtype=jnp.float32)  # reset_alpha()
        self.alpha = alpha
        self._x = None
        self.linear_factor = None

    def set_x(self, x):
        # linear_factor is produced by the same fused streaming pass as
        # forward(), so M is only read from HBM once per (set_x, forward) pair.
        self._x = x

    def reset_alpha(self, key):
        self.alpha = jax.random.normal(key, (self.n,), dtype=jnp.float32)

    def nn_orthant(self):
        self.alpha = jnp.maximum(self.alpha, 0.0)   # torch: alpha.data.clamp_(min=0)

    def forward(self):
        lf, mta, loss = dual_projection_fused(self.M, self._x, self.alpha)
        self.linear_factor = lf
        return mta, loss


# ---------------------------------------------------------------------------
# demo / correctness check
# ---------------------------------------------------------------------------
if __name__ == "__main__":
    # Small, non-tile-aligned shapes so ragged-edge masking, multi-tile
    # accumulation and the uneven core-split path are all exercised.
    n, m = 300, 400
    key = jax.random.PRNGKey(0)
    k_M, k_x, k_alpha = jax.random.split(key, 3)
    M = jax.random.normal(k_M, (n, m), dtype=jnp.float32)
    x = jax.random.normal(k_x, (m,), dtype=jnp.float32)
    alpha = jax.random.normal(k_alpha, (n,), dtype=jnp.float32)   # reset_alpha()

    # high-precision reference
    hp = jax.lax.Precision.HIGHEST
    lf_ref_v = jnp.dot(M, x, precision=hp) - 1.0
    mta_ref_v = jnp.dot(M.T, alpha, precision=hp)
    loss_ref_v = jnp.sum(mta_ref_v * mta_ref_v) + 4.0 * jnp.dot(lf_ref_v, alpha, precision=hp)

    # 1) production path: auto (generation-aware) tiles, 2-way core split
    lf1, mta1, loss1 = dual_projection_fused(M, x, alpha)
    jax.block_until_ready((lf1, mta1, loss1))
    assert jnp.allclose(lf1, lf_ref_v, rtol=1e-3, atol=1e-2), "lf mismatch (auto)"
    assert jnp.allclose(mta1, mta_ref_v, rtol=1e-3, atol=1e-2), "MTalpha mismatch (auto)"
    assert jnp.allclose(loss1, loss_ref_v, rtol=1e-3, atol=1.0), "loss mismatch (auto)"

    # 2) tiny explicit tiles: multi-tile accumulation, both ragged masks and
    #    the uneven core-split (clamped duplicate block) path.
    lf2, mta2, loss2 = dual_projection_fused(M, x, alpha,
                                             max_tn=128, max_tm=256, n_splits=2)
    jax.block_until_ready((lf2, mta2, loss2))
    assert jnp.allclose(lf2, lf_ref_v, rtol=1e-3, atol=1e-2), "lf mismatch (tiled)"
    assert jnp.allclose(mta2, mta_ref_v, rtol=1e-3, atol=1e-2), "MTalpha mismatch (tiled)"
    assert jnp.allclose(loss2, loss_ref_v, rtol=1e-3, atol=1.0), "loss mismatch (tiled)"

    # 3) bf16-M storage (recommended production dtype): f32 accumulation,
    #    loose tolerances for bf16 operand rounding.
    lf3, mta3, loss3 = dual_projection_fused(M.astype(jnp.bfloat16), x, alpha,
                                             max_tn=128, max_tm=256)
    jax.block_until_ready((lf3, mta3, loss3))
    assert jnp.allclose(lf3, lf_ref_v, rtol=5e-2, atol=1.0), "bf16 lf mismatch"
    assert jnp.allclose(mta3, mta_ref_v, rtol=5e-2, atol=0.5), "bf16 MTalpha mismatch"
    assert jnp.allclose(loss3, loss_ref_v, rtol=5e-2, atol=50.0), "bf16 loss mismatch"

    # 4) module-style API parity
    dp = DualProjection(M, alpha=alpha)
    dp.set_x(x)
    mta4, loss4 = dp.forward()
    jax.block_until_ready((mta4, loss4))
    assert jnp.allclose(dp.linear_factor, lf_ref_v, rtol=1e-3, atol=1e-2), "module lf mismatch"
    assert jnp.allclose(mta4, mta_ref_v, rtol=1e-3, atol=1e-2), "module MTalpha mismatch"
    assert jnp.allclose(loss4, loss_ref_v, rtol=1e-3, atol=1.0), "module loss mismatch"

    print("KERNEL_OK")
</pallas_src>

<mosaic_0001>
module attributes {stable_mosaic.version = 11 : i64} {
  func.func @kernel(%arg0: i32, %arg1: i32, %arg2: i32, %arg3: memref<1x512xf32, #tpu.memory_space<vmem>>, %arg4: memref<1x384xf32, #tpu.memory_space<vmem>>, %arg5: memref<384x512xf32, #tpu.memory_space<vmem>>, %arg6: memref<1x384xf32, #tpu.memory_space<vmem>>, %arg7: memref<1x512xf32, #tpu.memory_space<vmem>>, %arg8: memref<1x512xf32, #tpu.memory_space<vmem>>) attributes {dimension_semantics = [#tpu.dimension_semantics<parallel>, #tpu.dimension_semantics<arbitrary>, #tpu.dimension_semantics<arbitrary>], iteration_bounds = array<i64: 1, 1, 1>, scalar_prefetch = 0 : i64, scratch_operands = 1 : i64, tpu.core_type = #tpu.core_type<tc>, window_params = [{transform_indices = @transform_0, window_bounds = array<i64: 1, 512>}, {transform_indices = @transform_1, window_bounds = array<i64: 1, 384>}, {transform_indices = @transform_2, window_bounds = array<i64: 384, 512>}, {transform_indices = @transform_3, window_bounds = array<i64: 1, 384>}, {transform_indices = @transform_4, window_bounds = array<i64: 1, 512>}]} {
    %c0 = arith.constant 0 : index
    %c0_0 = arith.constant 0 : index
    %0 = vector.load %arg5[%c0, %c0_0] : memref<384x512xf32, #tpu.memory_space<vmem>>, vector<384x512xf32>
    %c1_i32 = arith.constant 1 : i32
    %1 = arith.muli %arg0, %c1_i32 : i32
    %2 = arith.addi %1, %arg1 : i32
    %c384_i32 = arith.constant 384 : i32
    %3 = arith.muli %2, %c384_i32 : i32
    %4 = tpu.iota {dimensions = array<i32: 0>} : vector<384x1xi32>
    %5 = vector.broadcast %3 : i32 to vector<384x1xi32>
    %6 = arith.addi %4, %5 : vector<384x1xi32>
    %c300_i32 = arith.constant 300 : i32
    %7 = vector.broadcast %c300_i32 : i32 to vector<384x1xi32>
    %8 = arith.cmpi slt, %6, %7 : vector<384x1xi32>
    %9 = tpu.iota {dimensions = array<i32: 1>} : vector<1x512xi32>
    %c512_i32 = arith.constant 512 : i32
    %10 = arith.muli %arg2, %c512_i32 : i32
    %11 = vector.broadcast %10 : i32 to vector<1x512xi32>
    %12 = arith.addi %9, %11 : vector<1x512xi32>
    %c400_i32 = arith.constant 400 : i32
    %13 = vector.broadcast %c400_i32 : i32 to vector<1x512xi32>
    %14 = arith.cmpi slt, %12, %13 : vector<1x512xi32>
    %15 = vector.broadcast %8 : vector<384x1xi1> to vector<384x512xi1>
    %16 = vector.broadcast %14 : vector<1x512xi1> to vector<384x512xi1>
    %17 = arith.andi %15, %16 : vector<384x512xi1>
    %cst = arith.constant 0.000000e+00 : f32
    %18 = vector.broadcast %cst : f32 to vector<384x512xf32>
    %19 = arith.select %17, %0, %18 : vector<384x512xi1>, vector<384x512xf32>
    %c0_1 = arith.constant 0 : index
    %c0_2 = arith.constant 0 : index
    %20 = vector.load %arg3[%c0_1, %c0_2] : memref<1x512xf32, #tpu.memory_space<vmem>>, vector<1x512xf32>
    %c0_3 = arith.constant 0 : index
    %c0_4 = arith.constant 0 : index
    %21 = vector.load %arg4[%c0_3, %c0_4] : memref<1x384xf32, #tpu.memory_space<vmem>>, vector<1x384xf32>
    %c0_i32 = arith.constant 0 : i32
    %22 = arith.cmpi eq, %arg2, %c0_i32 : i32
    %23 = arith.extui %22 : i1 to i32
    %c0_i32_5 = arith.constant 0 : i32
    %24 = arith.cmpi ne, %23, %c0_i32_5 : i32
    scf.if %24 {
      %cst_18 = arith.constant -1.000000e+00 : f32
      %39 = vector.broadcast %cst_18 : f32 to vector<1x384xf32>
      %c0_19 = arith.constant 0 : index
      %c0_20 = arith.constant 0 : index
      %40 = vector.load %arg6[%c0_19, %c0_20] : memref<1x384xf32, #tpu.memory_space<vmem>>, vector<1x384xf32>
      tpu.vector_store %arg6[%c0_19, %c0_20], %39 {strides = array<i32>} : memref<1x384xf32, #tpu.memory_space<vmem>>, vector<1x384xf32>,
    } else {
    }
    %c0_6 = arith.constant 0 : index
    %c0_7 = arith.constant 0 : index
    %25 = vector.load %arg6[%c0_6, %c0_7] : memref<1x384xf32, #tpu.memory_space<vmem>>, vector<1x384xf32>
    %cst_8 = arith.constant dense<0.000000e+00> : vector<1x384xf32>
    %26 = tpu.matmul %20, %19, %cst_8 {dimension_numbers = #tpu.dot_dimension_numbers<[1], [1], [0], [0], [0, 0, 1, 0], [], []>} : vector<1x512xf32>, vector<384x512xf32>, vector<1x384xf32> -> vector<1x384xf32>
    %27 = arith.addf %25, %26 : vector<1x384xf32>
    %c0_9 = arith.constant 0 : index
    %c0_10 = arith.constant 0 : index
    %28 = vector.load %arg6[%c0_9, %c0_10] : memref<1x384xf32, #tpu.memory_space<vmem>>, vector<1x384xf32>
    tpu.vector_store %arg6[%c0_9, %c0_10], %27 {strides = array<i32>} : memref<1x384xf32, #tpu.memory_space<vmem>>, vector<1x384xf32>,
    %cst_11 = arith.constant dense<0.000000e+00> : vector<1x512xf32>
    %29 = tpu.matmul %21, %19, %cst_11 {dimension_numbers = #tpu.dot_dimension_numbers<[1], [0], [0], [1], [0, 0, 1, 1], [], []>} : vector<1x384xf32>, vector<384x512xf32>, vector<1x512xf32> -> vector<1x512xf32>
    %c0_i32_12 = arith.constant 0 : i32
    %30 = arith.cmpi eq, %arg1, %c0_i32_12 : i32
    %31 = arith.extui %30 : i1 to i32
    %c0_i32_13 = arith.constant 0 : i32
    %32 = arith.cmpi ne, %31, %c0_i32_13 : i32
    scf.if %32 {
      %39 = arith.index_cast %arg2 : i32 to index
      %c0_18 = arith.constant 0 : index
      %40 = vector.load %arg8[%39, %c0_18] : memref<1x512xf32, #tpu.memory_space<vmem>>, vector<1x512xf32>
      tpu.vector_store %arg8[%39, %c0_18], %29 {strides = array<i32>} : memref<1x512xf32, #tpu.memory_space<vmem>>, vector<1x512xf32>,
    } else {
    }
    %c0_i32_14 = arith.constant 0 : i32
    %33 = arith.cmpi sgt, %arg1, %c0_i32_14 : i32
    %34 = arith.extui %33 : i1 to i32
    %c0_i32_15 = arith.constant 0 : i32
    %35 = arith.cmpi ne, %34, %c0_i32_15 : i32
    scf.if %35 {
      %39 = arith.index_cast %arg2 : i32 to index
      %c0_18 = arith.constant 0 : index
      %40 = vector.load %arg8[%39, %c0_18] : memref<1x512xf32, #tpu.memory_space<vmem>>, vector<1x512xf32>
      %41 = arith.addf %40, %29 : vector<1x512xf32>
      %42 = arith.index_cast %arg2 : i32 to index
      %c0_19 = arith.constant 0 : index
      %43 = vector.load %arg8[%42, %c0_19] : memref<1x512xf32, #tpu.memory_space<vmem>>, vector<1x512xf32>
      tpu.vector_store %arg8[%42, %c0_19], %41 {strides = array<i32>} : memref<1x512xf32, #tpu.memory_space<vmem>>, vector<1x512xf32>,
    } else {
    }
    %c0_i32_16 = arith.constant 0 : i32
    %36 = arith.cmpi eq, %arg1, %c0_i32_16 : i32
    %37 = arith.extui %36 : i1 to i32
    %c0_i32_17 = arith.constant 0 : i32
    %38 = arith.cmpi ne, %37, %c0_i32_17 : i32
    scf.if %38 {
      %39 = arith.index_cast %arg2 : i32 to index
      %c0_18 = arith.constant 0 : index
      %40 = vector.load %arg8[%39, %c0_18] : memref<1x512xf32, #tpu.memory_space<vmem>>, vector<1x512xf32>
      %c0_19 = arith.constant 0 : index
      %c0_20 = arith.constant 0 : index
      %41 = vector.load %arg7[%c0_19, %c0_20] : memref<1x512xf32, #tpu.memory_space<vmem>>, vector<1x512xf32>
      tpu.vector_store %arg7[%c0_19, %c0_20], %40 {strides = array<i32>} : memref<1x512xf32, #tpu.memory_space<vmem>>, vector<1x512xf32>,
    } else {
    }
    return
  }
  func.func @transform_0(%arg0: i32, %arg1: i32, %arg2: i32) -> (i32, i32) {
    %c0_i32 = arith.constant 0 : i32
    %c0_i32_0 = arith.constant 0 : i32
    return %c0_i32, %arg2 : i32, i32
  }
  func.func @transform_1(%arg0: i32, %arg1: i32, %arg2: i32) -> (i32, i32) {
    %c1_i32 = arith.constant 1 : i32
    %0 = arith.muli %arg0, %c1_i32 : i32
    %1 = arith.addi %0, %arg1 : i32
    %c0_i32 = arith.constant 0 : i32
    %c0_i32_0 = arith.constant 0 : i32
    return %c0_i32, %1 : i32, i32
  }
  func.func @transform_2(%arg0: i32, %arg1: i32, %arg2: i32) -> (i32, i32) {
    %c1_i32 = arith.constant 1 : i32
    %0 = arith.muli %arg0, %c1_i32 : i32
    %1 = arith.addi %0, %arg1 : i32
    %c0_i32 = arith.constant 0 : i32
    %2 = arith.minsi %1, %c0_i32 : i32
    %c0_i32_0 = arith.constant 0 : i32
    return %2, %arg2 : i32, i32
  }
  func.func @transform_3(%arg0: i32, %arg1: i32, %arg2: i32) -> (i32, i32) {
    %c1_i32 = arith.constant 1 : i32
    %0 = arith.muli %arg0, %c1_i32 : i32
    %1 = arith.addi %0, %arg1 : i32
    %c0_i32 = arith.constant 0 : i32
    %c0_i32_0 = arith.constant 0 : i32
    return %c0_i32, %1 : i32, i32
  }
  func.func @transform_4(%arg0: i32, %arg1: i32, %arg2: i32) -> (i32, i32) {
    %c1_i32 = arith.constant 1 : i32
    %0 = arith.muli %arg0, %c1_i32 : i32
    %1 = arith.addi %0, %arg2 : i32
    %c0_i32 = arith.constant 0 : i32
    %c0_i32_0 = arith.constant 0 : i32
    return %c0_i32, %1 : i32, i32
  }
}

</mosaic_0001>

<bundles_post_ra>
// kernel: tpu_custom_call.1
= control target key start
LH: loop header
LB: loop body
LE: loop exit
PB: predicated region body
PF: predicated region fallthrough
CT: control target
= control target key end

     0   :  { %10 = vsyncpa [#allocation4], 0  ;;  %v285_v3 = vlaneseq  ;;  %vm2206_vm1 = vmmov 1   ;;  %s3015_s0 = inlined_call_operand.vmem [shape: f32[1,512], index: 0, kind: input, shape index: {}]   ;;  %s3016_s1 = inlined_call_operand.vmem [shape: f32[1,384], index: 1, kind: input, shape index: {}]   ;;  %s3017_s2 = inlined_call_operand.vmem [shape: f32[300,400], index: 2, kind: input, shape index: {}]   ;;  %s3018_s3 = inlined_call_operand.hbm [shape: f32[1,384], index: 3, kind: output, shape index: {0}]   ;;  %s3019_s4 = inlined_call_operand.hbm [shape: f32[1,512], index: 4, kind: output, shape index: {1}]  }
   0x1   :  { %v92_v0 = vld [vmem:[%s3017_s2 + $0x8] sm:$0xff]  ;;  %v91_v6 = vld [vmem:[%s3017_s2] sm:$0xff]  ;;  %v222_v45 = vld [vmem:[%s3017_s2 + $0x418] sm:$0xff] }
   0x2   :  { %v96_v1 = vld [vmem:[%s3017_s2 + $0x28] sm:$0xff]  ;;  %v95_v7 = vld [vmem:[%s3017_s2 + $0x20] sm:$0xff]  ;;  %v2271_v13 = vshrl.u32 %v285_v3, 7  ;;  %v432_v31 = vand.u32 127, %v285_v3  ;;  %v226_v46 = vld [vmem:[%s3017_s2 + $0x438] sm:$0xff] }
   0x3   :  { %v220_v2 = vld [vmem:[%s3017_s2 + $0x408] sm:$0xff]  ;;  %v2246_v4 = vpack.c.bf16 %v96_v1, %v92_v0  ;;  %v2259_v9 = vpack.c.bf16 %v95_v7, %v91_v6  ;;  %v219_v10 = vld [vmem:[%s3017_s2 + $0x400] sm:$0xff]  ;;  %v2382_v50 = vpack.c.bf16 %v226_v46, %v222_v45  ;;  %v221_v55 = vld [vmem:[%s3017_s2 + $0x410] sm:$0xff] }
   0x4   :  { %v224_v5 = vld [vmem:[%s3017_s2 + $0x428] sm:$0xff]  ;;  %v223_v11 = vld [vmem:[%s3017_s2 + $0x420] sm:$0xff]  ;;  %v2292_v20 = vadd.s32 296, %v2271_v13  ;;  %v953_v27 = vsub.s32 1, %v2271_v13  ;;  %v435_v38 = vadd.s32 384, %v432_v31  ;;  %v949_v52 = vsub.s32 0, %v2271_v13 }
   0x5   :  { %v2257_v8 = vpack.c.bf16 %v224_v5, %v220_v2  ;;  %v100_v12 = vld [vmem:[%s3017_s2 + $0x48] sm:$0xff]  ;;  %1797 = vmatprep.subr.bf16.mxu0 %v2246_v4  ;;  %v2274_v14 = vpack.c.bf16 %v223_v11, %v219_v10  ;;  %v99_v21 = vld [vmem:[%s3017_s2 + $0x40] sm:$0xff]  ;;  %v225_v56 = vld [vmem:[%s3017_s2 + $0x430] sm:$0xff]  ;;  %v961_v59 = vsub.s32 3, %v2271_v13 }
   0x6   :  { %v104_v15 = vld [vmem:[%s3017_s2 + $0x68] sm:$0xff]  ;;  %1799 = vmatpush1.bf16.xpose.msra.mxu0 %v2259_v9  ;;  %v103_v22 = vld [vmem:[%s3017_s2 + $0x60] sm:$0xff]  ;;  %vm420_vm0 = vcmp.lt.s32.totalorder %v2292_v20, 300  ;;  %vm445_vm3 = vcmp.lt.s32.totalorder %v435_v38, 400  ;;  %v230_v60 = vld [vmem:[%s3017_s2 + $0x458] sm:$0xff]  ;;  %v2431_v0 = vpack.c.bf16 %v225_v56, %v221_v55 }
   0x7   :  { %v228_v16 = vld [vmem:[%s3017_s2 + $0x448] sm:$0xff]  ;;  %1941 = vmatprep.subr.bf16.mxu1 %v2257_v8  ;;  %v2287_v18 = vpack.c.bf16 %v104_v15, %v100_v12  ;;  %v227_v23 = vld [vmem:[%s3017_s2 + $0x440] sm:$0xff]  ;;  %v2322_v30 = vpack.c.bf16 %v103_v22, %v99_v21  ;;  %vm2342_vm2 = vmpackc.low %vm420_vm0, %vm2206_vm1 }
   0x8   :  { %v232_v17 = vld [vmem:[%s3017_s2 + $0x468] sm:$0xff]  ;;  %1943 = vmatpush1.bf16.xpose.msra.mxu1 %v2274_v14  ;;  %v231_v24 = vld [vmem:[%s3017_s2 + $0x460] sm:$0xff]  ;;  %vm2386_vm4 = vmpackc.low %vm445_vm3, %vm445_vm3 }
   0x9   :  { %v2289_v19 = vpack.c.bf16 %v232_v17, %v228_v16  ;;  %1801 = vmatprep.subr.bf16.mxu0 %v2287_v18  ;;  %v108_v25 = vld [vmem:[%s3017_s2 + $0x88] sm:$0xff]  ;;  %v2326_v32 = vpack.c.bf16 %v231_v24, %v227_v23  ;;  %v2333_v34 = vld [vmem:[%s3015_s0] sm:$0xf]  ;;  %v234_v61 = vld [vmem:[%s3017_s2 + $0x478] sm:$0xff]  ;;  %v957_v16 = vsub.s32 2, %v2271_v13 }
   0xa   :  { %v112_v26 = vld [vmem:[%s3017_s2 + $0xa8] sm:$0xff]  ;;  %v954_v36 = vrot.slane %v2333_v34, %v953_v27  ;;  %v107_v39 = vld [vmem:[%s3017_s2 + $0x80] sm:$0xff]  ;;  %v2429_v63 = vrot.slane %v2333_v34, %v949_v52  ;;  %v2435_v2 = vpack.c.bf16 %v234_v61, %v230_v60  ;;  %v2438_v5 = vrot.slane %v2333_v34, %v961_v59  ;;  %v229_v10 = vld [vmem:[%s3017_s2 + $0x450] sm:$0xff] }
   0xb   :  { %1945 = vmatprep.subr.bf16.mxu1 %v2289_v19  ;;  %v236_v28 = vld [vmem:[%s3017_s2 + $0x488] sm:$0xff]  ;;  %v2328_v33 = vpack.c.bf16 %v112_v26, %v108_v25  ;;  %v111_v40 = vld [vmem:[%s3017_s2 + $0xa0] sm:$0xff]  ;;  %v233_v11 = vld [vmem:[%s3017_s2 + $0x470] sm:$0xff]  ;;  %v2534_v55 = vrot.slane %v2333_v34, %v957_v16 }
   0xc   :  { %v240_v29 = vld [vmem:[%s3017_s2 + $0x4a8] sm:$0xff]  ;;  %1173 = vmatprep.mubr.f32.mxu1 %v954_v36  ;;  %v235_v41 = vld [vmem:[%s3017_s2 + $0x480] sm:$0xff]  ;;  %1031 = vmatprep.mubr.f32.mxu0 %v954_v36  ;;  %v2376_v47 = vpack.c.bf16 %v111_v40, %v107_v39  ;;  %v238_v17 = vld [vmem:[%s3017_s2 + $0x498] sm:$0xff]  ;;  %v2484_v25 = vpack.c.bf16 %v233_v11, %v229_v10 }
   0xd   :  { %v2335_v35 = vpack.c.bf16 %v240_v29, %v236_v28  ;;  %v239_v42 = vld [vmem:[%s3017_s2 + $0x4a0] sm:$0xff]  ;;  %v116_v43 = vld [vmem:[%s3017_s2 + $0xc8] sm:$0xff]  ;;  %v242_v21 = vld [vmem:[%s3017_s2 + $0x4b8] sm:$0xff] }
   0xe   :  { %1803 = vmatpush1.bf16.xpose.msra.mxu0 %v2322_v30  ;;  %v120_v44 = vld [vmem:[%s3017_s2 + $0xe8] sm:$0xff]  ;;  %v2378_v48 = vpack.c.bf16 %v239_v42, %v235_v41  ;;  %v115_v53 = vld [vmem:[%s3017_s2 + $0xc0] sm:$0xff]  ;;  %vm701_vm5 = vmand %vm420_vm0, %vm445_vm3  ;;  %v2486_v28 = vpack.c.bf16 %v242_v21, %v238_v17 }
   0xf   :  { %1805 = vmatprep.subr.bf16.mxu0 %v2328_v33  ;;  %v2380_v49 = vpack.c.bf16 %v120_v44, %v116_v43  ;;  %v119_v54 = vld [vmem:[%s3017_s2 + $0xe0] sm:$0xff]  ;;  %v124_v57 = vld [vmem:[%s3017_s2 + $0x108] sm:$0xff]  ;;  %vm2489_vm6 = vmpackc.low %vm701_vm5, %vm445_vm3 }
  0x10   :  { %1947 = vmatpush1.bf16.xpose.msra.mxu1 %v2326_v32  ;;  %v128_v58 = vld [vmem:[%s3017_s2 + $0x128] sm:$0xff]  ;;  %v2424_v62 = vpack.c.bf16 %v119_v54, %v115_v53  ;;  %v123_v6 = vld [vmem:[%s3017_s2 + $0x100] sm:$0xff]  ;;  %v237_v36 = vld [vmem:[%s3017_s2 + $0x490] sm:$0xff] }
  0x11   :  { %1950 = vmatprep.subr.msk.bf16.mxu1 %vm2342_vm2, %v2335_v35  ;;  %v2433_v1 = vpack.c.bf16 %v128_v58, %v124_v57  ;;  %v127_v7 = vld [vmem:[%s3017_s2 + $0x120] sm:$0xff]  ;;  %v132_v12 = vld [vmem:[%s3017_s2 + $0x148] sm:$0xff]  ;;  %v241_v38 = vld [vmem:[%s3017_s2 + $0x4b0] sm:$0xff] }
  0x12   :  { %v136_v15 = vld [vmem:[%s3017_s2 + $0x168] sm:$0xff]  ;;  %v2476_v22 = vld [vmem:[%s3016_s1] sm:$0x7]  ;;  %v1814_v23 = vpack.c.bf16 %v127_v7, %v123_v6  ;;  %v2515_v42 = vpack.c.bf16 %v241_v38, %v237_v36 }
  0x13   :  { %v2482_v24 = vrot.slane %v2476_v22, %v957_v16  ;;  %v1816_v26 = vpack.c.bf16 %v136_v15, %v132_v12  ;;  %v131_v20 = vld [vmem:[%s3017_s2 + $0x140] sm:$0xff]  ;;  %v140_v39 = vld [vmem:[%s3017_s2 + $0x188] sm:$0xff] }
  0x14   :  { %v135_v31 = vld [vmem:[%s3017_s2 + $0x160] sm:$0xff]  ;;  %v144_v40 = vld [vmem:[%s3017_s2 + $0x1a8] sm:$0xff] }
  0x15   :  { %v1818_v41 = vpack.c.bf16 %v135_v31, %v131_v20  ;;  %v1820_v43 = vpack.c.bf16 %v144_v40, %v140_v39  ;;  %v139_v44 = vld [vmem:[%s3017_s2 + $0x180] sm:$0xff]  ;;  %v148_v46 = vld [vmem:[%s3017_s2 + $0x1c8] sm:$0xff] }
  0x16   :  { %1807 = vmatpush1.bf16.xpose.msra.mxu0 %v2376_v47  ;;  %v143_v45 = vld [vmem:[%s3017_s2 + $0x1a0] sm:$0xff]  ;;  %v152_v53 = vld [vmem:[%s3017_s2 + $0x1e8] sm:$0xff] }
  0x17   :  { %1809 = vmatprep.subr.bf16.mxu0 %v2380_v49  ;;  %v1822_v54 = vpack.c.bf16 %v143_v45, %v139_v44 }
  0x18   :  { %1953 = vmatpush1.bf16.xpose.msk.msra.mxu1 %vm2342_vm2, %v2378_v48 }
  0x19   :  { %1956 = vmatprep.subr.msk.bf16.mxu1 %vm2386_vm4, %v2382_v50 }
  0x1e   :  { %1811 = vmatpush1.bf16.xpose.msra.mxu0 %v2424_v62 }
  0x1f   :  { %1174 = vmatmul.mubr.f32.vlgmr.msra.gmra.mrb[0].mxu1 %v2429_v63  ;;  %1813 = vmatprep.subr.bf16.mxu0 %v2433_v1 }
  0x20   :  { %1958 = vmatpush1.bf16.xpose.msra.mxu1 %v2431_v0  ;;  %1243 = vmatprep.mubr.f32.mxu1 %v2438_v5 }
  0x21   :  { %1961 = vmatprep.subr.msk.bf16.mxu1 %vm2386_vm4, %v2435_v2 }
  0x26   :  { %1815 = vmatpush1.bf16.xpose.msra.mxu0 %v1814_v23 }
  0x27   :  { %1817 = vmatprep.subr.bf16.mxu0 %v1816_v26 }
  0x28   :  { %1963 = vmatpush1.bf16.xpose.msra.mxu1 %v2484_v25 }
  0x29   :  { %1966 = vmatprep.subr.msk.bf16.mxu1 %vm2489_vm6, %v2486_v28 }
  0x2e   :  { %1819 = vmatpush1.bf16.xpose.msra.mxu0 %v1818_v41 }
  0x2f   :  { %1821 = vmatprep.subr.bf16.mxu0 %v1820_v43 }
  0x30   :  { %1969 = vmatpush1.bf16.xpose.msk.msra.mxu1 %vm2342_vm2, %v2515_v42 }
  0x31   :  { %1971 = vmatprep.subr.bf16.mxu1 %v2246_v4 }
  0x32   :  { %11 = vsyncpa [#allocation6], 0  ;;  %v1824_v56 = vpack.c.bf16 %v152_v53, %v148_v46  ;;  %v2539_v57 = vrot.slane %v2476_v22, %v953_v27  ;;  %v147_v4 = vld [vmem:[%s3017_s2 + $0x1c0] sm:$0xff]  ;;  %v156_v27 = vld [vmem:[%s3017_s2 + $0x208] sm:$0xff]  ;;  %vm2981_vm7 = vcmp.lt.s32.totalorder %v285_v3, 384  ;;  %vm1617_vm8 = vcmp.lt.s32.totalorder %v285_v3, 512 }
  0x33   :  { %v151_v34 = vld [vmem:[%s3017_s2 + $0x1e0] sm:$0xff]  ;;  %v160_v58 = vld [vmem:[%s3017_s2 + $0x228] sm:$0xff]  ;;  %v2209_v29 = vmov 1966171168  }
  0x34   :  { %v1828_v59 = vpack.c.bf16 %v160_v58, %v156_v27  ;;  %v159_v60 = vld [vmem:[%s3017_s2 + $0x220] sm:$0xff]  ;;  %v172_v7 = vld [vmem:[%s3017_s2 + $0x288] sm:$0xff]  ;;  %v1254_v51 = vunpack.c.l.s4 %v2209_v29 }
  0x35   :  { %v167_v6 = vld [vmem:[%s3017_s2 + $0x260] sm:$0xff]  ;;  %v180_v15 = vld [vmem:[%s3017_s2 + $0x2c8] sm:$0xff] }
  0x36   :  { %1823 = vmatpush1.bf16.xpose.msra.mxu0 %v1822_v54  ;;  %v171_v11 = vld [vmem:[%s3017_s2 + $0x280] sm:$0xff]  ;;  %v184_v16 = vld [vmem:[%s3017_s2 + $0x2e8] sm:$0xff] }
  0x37   :  { %1244 = vmatmul.mubr.f32.vlgmr.msra.gmra.mrb[0].mxu1 %v2534_v55  ;;  %1825 = vmatprep.subr.bf16.mxu0 %v1824_v56  ;;  %v175_v12 = vld [vmem:[%s3017_s2 + $0x2a0] sm:$0xff]  ;;  %v1840_v21 = vpack.c.bf16 %v184_v16, %v180_v15  ;;  %v188_v20 = vld [vmem:[%s3017_s2 + $0x308] sm:$0xff]  ;;  %v109_v15 = vld [vmem:[%s3017_s2 + $0x90] sm:$0xff] }
  0x38   :  { %1973 = vmatpush1.bf16.msra.mxu1 %v2259_v9  ;;  %1362 = vmatprep.mubr.f32.mxu1 %v2539_v57  ;;  %v1826_v9 = vpack.c.bf16 %v151_v34, %v147_v4  ;;  %v1838_v17 = vpack.c.bf16 %v175_v12, %v171_v11  ;;  %v192_v31 = vld [vmem:[%s3017_s2 + $0x328] sm:$0xff]  ;;  %v187_v39 = vld [vmem:[%s3017_s2 + $0x300] sm:$0xff]  ;;  %v113_v16 = vld [vmem:[%s3017_s2 + $0xb0] sm:$0xff] }
  0x39   :  { %1975 = vmatprep.subr.bf16.mxu1 %v2287_v18  ;;  %v155_v18 = vld [vmem:[%s3017_s2 + $0x200] sm:$0xff]  ;;  %v1844_v38 = vpack.c.bf16 %v192_v31, %v188_v20  ;;  %v130_v20 = vld [vmem:[%s3017_s2 + $0x138] sm:$0xff] }
  0x3a   :  { %v191_v40 = vld [vmem:[%s3017_s2 + $0x320] sm:$0xff] }
  0x3b   :  { %v1846_v44 = vpack.c.bf16 %v191_v40, %v187_v39  ;;  %v195_v46 = vld [vmem:[%s3017_s2 + $0x340] sm:$0xff]  ;;  %v129_v39 = vld [vmem:[%s3017_s2 + $0x130] sm:$0xff]  ;;  %v134_v40 = vld [vmem:[%s3017_s2 + $0x158] sm:$0xff] }
  0x3c   :  { %1977 = vmatpush1.bf16.msra.mxu1 %v2322_v30  ;;  %v164_v30 = vld [vmem:[%s3017_s2 + $0x248] sm:$0xff]  ;;  %v199_v53 = vld [vmem:[%s3017_s2 + $0x360] sm:$0xff] }
  0x3d   :  { %1979 = vmatprep.subr.bf16.mxu1 %v2328_v33  ;;  %v168_v33 = vld [vmem:[%s3017_s2 + $0x268] sm:$0xff]  ;;  %v1850_v4 = vpack.c.bf16 %v199_v53, %v195_v46  ;;  %v203_v27 = vld [vmem:[%s3017_s2 + $0x380] sm:$0xff]  ;;  %v137_v46 = vld [vmem:[%s3017_s2 + $0x170] sm:$0xff] }
  0x3e   :  { %1827 = vmatpush1.bf16.xpose.msra.mxu0 %v1826_v9  ;;  %v1832_v61 = vpack.c.bf16 %v168_v33, %v164_v30  ;;  %v207_v58 = vld [vmem:[%s3017_s2 + $0x3a0] sm:$0xff]  ;;  %v142_v53 = vld [vmem:[%s3017_s2 + $0x198] sm:$0xff] }
  0x3f   :  { %1829 = vmatprep.subr.bf16.mxu0 %v1828_v59  ;;  %v211_v30 = vld [vmem:[%s3017_s2 + $0x3c0] sm:$0xff] }
  0x40   :  { %1981 = vmatpush1.bf16.msra.mxu1 %v2376_v47  ;;  %v1830_v47 = vpack.c.bf16 %v159_v60, %v155_v18  ;;  %v1854_v18 = vpack.c.bf16 %v207_v58, %v203_v27  ;;  %v215_v33 = vld [vmem:[%s3017_s2 + $0x3e0] sm:$0xff]  ;;  %v145_v27 = vld [vmem:[%s3017_s2 + $0x1b0] sm:$0xff]  ;;  %v150_v58 = vld [vmem:[%s3017_s2 + $0x1d8] sm:$0xff] }
  0x41   :  { %1983 = vmatprep.subr.bf16.mxu1 %v2380_v49  ;;  %v163_v49 = vld [vmem:[%s3017_s2 + $0x240] sm:$0xff] }
  0x44   :  { %1985 = vmatpush1.bf16.msra.mxu1 %v2424_v62  ;;  %v176_v62 = vld [vmem:[%s3017_s2 + $0x2a8] sm:$0xff] }
  0x45   :  { %1987 = vmatprep.subr.bf16.mxu1 %v2433_v1  ;;  %v1834_v1 = vpack.c.bf16 %v167_v6, %v163_v49  ;;  %v1836_v10 = vpack.c.bf16 %v176_v62, %v172_v7  ;;  %v2207_v49 = vmov 0.0   ;;  %v94_v6 = vld [vmem:[%s3017_s2 + $0x18] sm:$0xff]  ;;  %v101_v62 = vld [vmem:[%s3017_s2 + $0x50] sm:$0xff] }
  0x46   :  { %1831 = vmatpush1.bf16.xpose.msra.mxu0 %v1830_v47 }
  0x47   :  { %1833 = vmatprep.subr.bf16.mxu0 %v1832_v61 }
  0x48   :  { %1989 = vmatpush1.bf16.msra.mxu1 %v1814_v23  ;;  %v179_v23 = vld [vmem:[%s3017_s2 + $0x2c0] sm:$0xff] }
  0x49   :  { %1991 = vmatprep.subr.bf16.mxu1 %v1816_v26  ;;  %v183_v26 = vld [vmem:[%s3017_s2 + $0x2e0] sm:$0xff] }
  0x4a   :  { %v1842_v36 = vpack.c.bf16 %v183_v26, %v179_v23  ;;  %v117_v23 = vld [vmem:[%s3017_s2 + $0xd0] sm:$0xff] }
  0x4b   :  { %v121_v26 = vld [vmem:[%s3017_s2 + $0xf0] sm:$0xff] }
  0x4c   :  { %1993 = vmatpush1.bf16.msra.mxu1 %v1818_v41  ;;  %v196_v41 = vld [vmem:[%s3017_s2 + $0x348] sm:$0xff]  ;;  %v1878_v31 = vpack.c.bf16 %v121_v26, %v117_v23  ;;  %v185_v23 = vld [vmem:[%s3017_s2 + $0x2f0] sm:$0xff]  ;;  %v190_v26 = vld [vmem:[%s3017_s2 + $0x318] sm:$0xff] }
  0x4d   :  { %1995 = vmatprep.subr.bf16.mxu1 %v1820_v43  ;;  %v200_v43 = vld [vmem:[%s3017_s2 + $0x368] sm:$0xff] }
  0x4e   :  { %1835 = vmatpush1.bf16.xpose.msra.mxu0 %v1834_v1  ;;  %v1848_v45 = vpack.c.bf16 %v200_v43, %v196_v41  ;;  %v138_v41 = vld [vmem:[%s3017_s2 + $0x178] sm:$0xff] }
  0x4f   :  { %1837 = vmatprep.subr.bf16.mxu0 %v1836_v10 }
  0x50   :  { %1997 = vmatpush1.bf16.msra.mxu1 %v1822_v54  ;;  %v204_v54 = vld [vmem:[%s3017_s2 + $0x388] sm:$0xff] }
  0x51   :  { %1999 = vmatprep.subr.bf16.mxu1 %v1824_v56  ;;  %v208_v56 = vld [vmem:[%s3017_s2 + $0x3a8] sm:$0xff] }
  0x52   :  { %v1852_v34 = vpack.c.bf16 %v208_v56, %v204_v54  ;;  %v146_v54 = vld [vmem:[%s3017_s2 + $0x1b8] sm:$0xff] }
  0x54   :  { %2001 = vmatpush1.bf16.msra.mxu1 %v1826_v9  ;;  %v212_v9 = vld [vmem:[%s3017_s2 + $0x3c8] sm:$0xff] }
  0x55   :  { %2003 = vmatprep.subr.bf16.mxu1 %v1828_v59  ;;  %v216_v59 = vld [vmem:[%s3017_s2 + $0x3e8] sm:$0xff] }
  0x56   :  { %1839 = vmatpush1.bf16.xpose.msra.mxu0 %v1838_v17  ;;  %v1856_v60 = vpack.c.bf16 %v216_v59, %v212_v9  ;;  %v154_v9 = vld [vmem:[%s3017_s2 + $0x1f8] sm:$0xff] }
  0x57   :  { %1841 = vmatprep.subr.bf16.mxu0 %v1840_v21 }
  0x58   :  { %2005 = vmatpush1.bf16.msra.mxu1 %v1830_v47  ;;  %v1858_v47 = vpack.c.bf16 %v215_v33, %v211_v30  ;;  %v153_v30 = vld [vmem:[%s3017_s2 + $0x1f0] sm:$0xff]  ;;  %v158_v33 = vld [vmem:[%s3017_s2 + $0x218] sm:$0xff] }
  0x59   :  { %2007 = vmatprep.subr.bf16.mxu1 %v1832_v61  ;;  %v2656_v61 = vrot.slane %v2476_v22, %v949_v52  ;;  %v98_v52 = vld [vmem:[%s3017_s2 + $0x38] sm:$0xff] }
  0x5a   :  { %v102_v22 = vld [vmem:[%s3017_s2 + $0x58] sm:$0xff] }
  0x5c   :  { %2009 = vmatpush1.bf16.msra.mxu1 %v1834_v1  ;;  %v105_v1 = vld [vmem:[%s3017_s2 + $0x70] sm:$0xff] }
  0x5d   :  { %2011 = vmatprep.subr.bf16.mxu1 %v1836_v10  ;;  %v114_v10 = vld [vmem:[%s3017_s2 + $0xb8] sm:$0xff]  ;;  %v1868_v11 = vpack.c.bf16 %v105_v1, %v101_v62  ;;  %v169_v62 = vld [vmem:[%s3017_s2 + $0x270] sm:$0xff] }
  0x5e   :  { %1843 = vmatpush1.bf16.xpose.msra.mxu0 %v1842_v36  ;;  %v174_v1 = vld [vmem:[%s3017_s2 + $0x298] sm:$0xff] }
  0x5f   :  { %1845 = vmatprep.subr.bf16.mxu0 %v1844_v38 }
  0x60   :  { %2013 = vmatpush1.bf16.msra.mxu1 %v1838_v17  ;;  %v118_v17 = vld [vmem:[%s3017_s2 + $0xd8] sm:$0xff] }
  0x61   :  { %2015 = vmatprep.subr.bf16.mxu1 %v1840_v21  ;;  %v1873_v21 = vpack.c.bf16 %v113_v16, %v109_v15  ;;  %v177_v15 = vld [vmem:[%s3017_s2 + $0x2b0] sm:$0xff]  ;;  %v182_v16 = vld [vmem:[%s3017_s2 + $0x2d8] sm:$0xff] }
  0x64   :  { %2017 = vmatpush1.bf16.msra.mxu1 %v1842_v36 }
  0x65   :  { %2019 = vmatprep.subr.bf16.mxu1 %v1844_v38  ;;  %v125_v38 = vld [vmem:[%s3017_s2 + $0x110] sm:$0xff] }
  0x66   :  { %1847 = vmatpush1.bf16.xpose.msra.mxu0 %v1846_v44  ;;  %v1883_v43 = vpack.c.bf16 %v129_v39, %v125_v38  ;;  %v193_v38 = vld [vmem:[%s3017_s2 + $0x330] sm:$0xff]  ;;  %v198_v39 = vld [vmem:[%s3017_s2 + $0x358] sm:$0xff] }
  0x67   :  { %1849 = vmatprep.subr.bf16.mxu0 %v1848_v45 }
  0x68   :  { %2021 = vmatpush1.bf16.msra.mxu1 %v1846_v44  ;;  %v1885_v44 = vpack.c.bf16 %v138_v41, %v134_v40  ;;  %v202_v40 = vld [vmem:[%s3017_s2 + $0x378] sm:$0xff] }
  0x69   :  { %2023 = vmatprep.subr.bf16.mxu1 %v1848_v45  ;;  %v133_v45 = vld [vmem:[%s3017_s2 + $0x150] sm:$0xff] }
  0x6a   :  { %v1888_v56 = vpack.c.bf16 %v137_v46, %v133_v45  ;;  %v201_v45 = vld [vmem:[%s3017_s2 + $0x370] sm:$0xff]  ;;  %v206_v46 = vld [vmem:[%s3017_s2 + $0x398] sm:$0xff] }
  0x6c   :  { %2025 = vmatpush1.bf16.msra.mxu1 %v1850_v4 }
  0x6d   :  { %2027 = vmatprep.subr.bf16.mxu1 %v1852_v34 }
  0x6e   :  { %1851 = vmatpush1.bf16.xpose.msra.mxu0 %v1850_v4  ;;  %v1890_v4 = vpack.c.bf16 %v146_v54, %v142_v53  ;;  %v210_v53 = vld [vmem:[%s3017_s2 + $0x3b8] sm:$0xff] }
  0x6f   :  { %1853 = vmatprep.subr.bf16.mxu0 %v1852_v34  ;;  %v141_v34 = vld [vmem:[%s3017_s2 + $0x190] sm:$0xff] }
  0x70   :  { %2029 = vmatpush1.bf16.msra.mxu1 %v1854_v18  ;;  %v2782_v59 = vpack.c.bf16 %v145_v27, %v141_v34  ;;  %v209_v34 = vld [vmem:[%s3017_s2 + $0x3b0] sm:$0xff]  ;;  %v214_v27 = vld [vmem:[%s3017_s2 + $0x3d8] sm:$0xff] }
  0x71   :  { %2031 = vmatprep.subr.bf16.mxu1 %v1856_v60 }
  0x74   :  { %2033 = vmatpush1.bf16.msra.mxu1 %v1858_v47 }
  0x75   :  { %2035 = vmatprep.subr.bf16.mxu1 %v2257_v8  ;;  %v1860_v8 = vpack.c.bf16 %v98_v52, %v94_v6 }
  0x76   :  { %1855 = vmatpush1.bf16.xpose.msra.mxu0 %v1854_v18  ;;  %v2788_v18 = vpack.c.bf16 %v154_v9, %v150_v58  ;;  %v218_v58 = vld [vmem:[%s3017_s2 + $0x3f8] sm:$0xff] }
  0x77   :  { %1363 = vmatmul.mubr.f32.vlgmr.msra.gmra.mrb[2].mxu1 %v2656_v61  ;;  %1857 = vmatprep.subr.bf16.mxu0 %v1856_v60  ;;  %v149_v60 = vld [vmem:[%s3017_s2 + $0x1d0] sm:$0xff] }
  0x78   :  { %2037 = vmatpush1.bf16.msra.mxu1 %v2274_v14  ;;  %1433 = vmatprep.mubr.f32.mxu1 %v2207_v49  ;;  %v93_v14 = vld [vmem:[%s3017_s2 + $0x10] sm:$0xff]  ;;  %v2803_v6 = vpack.c.bf16 %v153_v30, %v149_v60  ;;  %v1935_v60 = vpack.c.bf16 %v218_v58, %v214_v27 }
  0x79   :  { %2039 = vmatprep.subr.bf16.mxu1 %v2289_v19  ;;  %v97_v19 = vld [vmem:[%s3017_s2 + $0x30] sm:$0xff] }
  0x7a   :  { %v213_v30 = vld [vmem:[%s3017_s2 + $0x3d0] sm:$0xff] }
  0x7c   :  { %2041 = vmatpush1.bf16.msra.mxu1 %v2326_v32  ;;  %v106_v32 = vld [vmem:[%s3017_s2 + $0x78] sm:$0xff] }
  0x7d   :  { %2044 = vmatprep.subr.msk.bf16.mxu1 %vm2342_vm2, %v2335_v35  ;;  %v1863_v35 = vpack.c.bf16 %v97_v19, %v93_v14  ;;  %v1865_v7 = vpack.c.bf16 %v106_v32, %v102_v22  ;;  %v161_v14 = vld [vmem:[%s3017_s2 + $0x230] sm:$0xff]  ;;  %v166_v19 = vld [vmem:[%s3017_s2 + $0x258] sm:$0xff] }
  0x7e   :  { %1859 = vmatpush1.bf16.xpose.msra.mxu0 %v1858_v47  ;;  %v162_v47 = vld [vmem:[%s3017_s2 + $0x238] sm:$0xff] }
  0x7f   :  { %1862 = vmatprep.subr.msk.bf16.mxu0 %vm2386_vm4, %v1860_v8  ;;  %v2808_v52 = vpack.c.bf16 %v162_v47, %v158_v33  ;;  %v170_v22 = vld [vmem:[%s3017_s2 + $0x278] sm:$0xff]  ;;  %v217_v33 = vld [vmem:[%s3017_s2 + $0x3f0] sm:$0xff] }
  0x80   :  { %2047 = vmatpush1.bf16.msk.msra.mxu1 %vm2342_vm2, %v2378_v48  ;;  %v110_v48 = vld [vmem:[%s3017_s2 + $0x98] sm:$0xff] }
  0x81   :  { %2050 = vmatprep.subr.msk.bf16.mxu1 %vm2386_vm4, %v1860_v8  ;;  %v1870_v12 = vpack.c.bf16 %v114_v10, %v110_v48  ;;  %v157_v8 = vld [vmem:[%s3017_s2 + $0x210] sm:$0xff]  ;;  %v178_v48 = vld [vmem:[%s3017_s2 + $0x2b8] sm:$0xff] }
  0x82   :  { %v2823_v32 = vpack.c.bf16 %v161_v14, %v157_v8 }
  0x83   :  { %1434 = vmatmul.mubr.f32.vlgmr.msra.gmra.mrb[2].mxu1 %v2482_v24 }
  0x84   :  { %2052 = vmatpush1.bf16.msra.mxu1 %v1863_v35  ;;  %1504 = vmatprep.mubr.f32.mxu1 %v2539_v57  ;;  %v122_v57 = vld [vmem:[%s3017_s2 + $0xf8] sm:$0xff] }
  0x85   :  { %2055 = vmatprep.subr.msk.bf16.mxu1 %vm2386_vm4, %v1865_v7  ;;  %1032 = vmatmul.mubr.f32.vlgmr.msra.gmra.mrb[0].mxu0 %v2429_v63  ;;  %v1875_v63 = vpack.c.bf16 %v122_v57, %v118_v17  ;;  %v186_v17 = vld [vmem:[%s3017_s2 + $0x2f8] sm:$0xff] }
  0x86   :  { %1864 = vmatpush1.bf16.xpose.msra.mxu0 %v1863_v35  ;;  %1102 = vmatprep.mubr.f32.mxu0 %v2438_v5  ;;  %v126_v5 = vld [vmem:[%s3017_s2 + $0x118] sm:$0xff]  ;;  %v2830_v35 = vpack.c.bf16 %v170_v22, %v166_v19 }
  0x87   :  { %1867 = vmatprep.subr.msk.bf16.mxu0 %vm2386_vm4, %v1865_v7  ;;  %v1880_v36 = vpack.c.bf16 %v130_v20, %v126_v5  ;;  %v165_v7 = vld [vmem:[%s3017_s2 + $0x250] sm:$0xff]  ;;  %v194_v5 = vld [vmem:[%s3017_s2 + $0x338] sm:$0xff] }
  0x88   :  { %2057 = vmatpush1.bf16.msra.mxu1 %v1868_v11  ;;  %v2845_v10 = vpack.c.bf16 %v169_v62, %v165_v7 }
  0x89   :  { %2060 = vmatprep.subr.msk.bf16.mxu1 %vm2386_vm4, %v1870_v12 }
  0x8c   :  { %2062 = vmatpush1.bf16.msra.mxu1 %v1873_v21 }
  0x8d   :  { %2065 = vmatprep.subr.msk.bf16.mxu1 %vm2386_vm4, %v1875_v63 }
  0x8e   :  { %1869 = vmatpush1.bf16.xpose.msra.mxu0 %v1868_v11  ;;  %v2850_v11 = vpack.c.bf16 %v178_v48, %v174_v1 }
  0x8f   :  { %1872 = vmatprep.subr.msk.bf16.mxu0 %vm2386_vm4, %v1870_v12  ;;  %v173_v12 = vld [vmem:[%s3017_s2 + $0x290] sm:$0xff] }
  0x90   :  { %2067 = vmatpush1.bf16.msra.mxu1 %v1878_v31  ;;  %v1913_v57 = vpack.c.bf16 %v177_v15, %v173_v12 }
  0x91   :  { %2070 = vmatprep.subr.msk.bf16.mxu1 %vm2386_vm4, %v1880_v36 }
  0x94   :  { %2072 = vmatpush1.bf16.msra.mxu1 %v1883_v43 }
  0x95   :  { %2075 = vmatprep.subr.msk.bf16.mxu1 %vm2386_vm4, %v1885_v44 }
  0x96   :  { %1874 = vmatpush1.bf16.xpose.msra.mxu0 %v1873_v21  ;;  %v1915_v21 = vpack.c.bf16 %v186_v17, %v182_v16 }
  0x97   :  { %1877 = vmatprep.subr.msk.bf16.mxu0 %vm2386_vm4, %v1875_v63  ;;  %v181_v63 = vld [vmem:[%s3017_s2 + $0x2d0] sm:$0xff] }
  0x98   :  { %2077 = vmatpush1.bf16.msra.mxu1 %v1888_v56  ;;  %v1918_v20 = vpack.c.bf16 %v185_v23, %v181_v63 }
  0x99   :  { %2080 = vmatprep.subr.msk.bf16.mxu1 %vm2386_vm4, %v1890_v4 }
  0x9c   :  { %2082 = vmatpush1.bf16.msra.mxu1 %v2782_v59 }
  0x9d   :  { %2085 = vmatprep.subr.msk.bf16.mxu1 %vm2386_vm4, %v2788_v18 }
  0x9e   :  { %1879 = vmatpush1.bf16.xpose.msra.mxu0 %v1878_v31  ;;  %v1920_v31 = vpack.c.bf16 %v194_v5, %v190_v26 }
  0x9f   :  { %1882 = vmatprep.subr.msk.bf16.mxu0 %vm2386_vm4, %v1880_v36  ;;  %v189_v36 = vld [vmem:[%s3017_s2 + $0x310] sm:$0xff] }
  0xa0   :  { %2087 = vmatpush1.bf16.msra.mxu1 %v2803_v6  ;;  %v1923_v41 = vpack.c.bf16 %v193_v38, %v189_v36 }
  0xa1   :  { %2090 = vmatprep.subr.msk.bf16.mxu1 %vm2386_vm4, %v2808_v52 }
  0xa4   :  { %2092 = vmatpush1.bf16.msra.mxu1 %v2823_v32 }
  0xa5   :  { %2095 = vmatprep.subr.msk.bf16.mxu1 %vm2386_vm4, %v2830_v35 }
  0xa6   :  { %1884 = vmatpush1.bf16.xpose.msra.mxu0 %v1883_v43  ;;  %v1925_v43 = vpack.c.bf16 %v202_v40, %v198_v39 }
  0xa7   :  { %1887 = vmatprep.subr.msk.bf16.mxu0 %vm2386_vm4, %v1885_v44  ;;  %v197_v44 = vld [vmem:[%s3017_s2 + $0x350] sm:$0xff] }
  0xa8   :  { %2097 = vmatpush1.bf16.msra.mxu1 %v2845_v10  ;;  %v1928_v54 = vpack.c.bf16 %v201_v45, %v197_v44 }
  0xa9   :  { %2100 = vmatprep.subr.msk.bf16.mxu1 %vm2386_vm4, %v2850_v11 }
  0xac   :  { %2102 = vmatpush1.bf16.msra.mxu1 %v1913_v57 }
  0xad   :  { %2105 = vmatprep.subr.msk.bf16.mxu1 %vm2386_vm4, %v1915_v21 }
  0xae   :  { %1889 = vmatpush1.bf16.xpose.msra.mxu0 %v1888_v56  ;;  %v1930_v56 = vpack.c.bf16 %v210_v53, %v206_v46 }
  0xaf   :  { %1892 = vmatprep.subr.msk.bf16.mxu0 %vm2386_vm4, %v1890_v4  ;;  %v205_v4 = vld [vmem:[%s3017_s2 + $0x390] sm:$0xff]  ;;  %s2210_s2 = smov [#allocation5]  }
  0xb0   :  { %2107 = vmatpush1.bf16.msra.mxu1 %v1918_v20  ;;  %v1933_v9 = vpack.c.bf16 %v209_v34, %v205_v4  ;;  %s1693_s19 = sshll.u32 %s2210_s2, 4  ;;  %s1694_s19 = int_to_ptr.vmem [resolvable:$true] %s1693_s19 }
  0xb1   :  { %2110 = vmatprep.subr.msk.bf16.mxu1 %vm2386_vm4, %v1920_v31  ;;  %s2158_s20 = scalar_lea.vmem %s1694_s19, 64  ;;  %p2163_p1 = scmp.lt.s32.totalorder %s1694_s19, %s1694_s19 }
  0xb2   :  { %p2159_p0 = scmp.ne.s32.totalorder %s1694_s19, %s2158_s20  ;;  %p2164_p2 = scmp.lt.s32.totalorder %s2158_s20, %s2158_s20 }
  0xb4   :  { %2112 = vmatpush1.bf16.msra.mxu1 %v1923_v41  ;;  %p2165_p3 = por %p2164_p2, %p2163_p1 }
  0xb5   :  { %2115 = vmatprep.subr.msk.bf16.mxu1 %vm2386_vm4, %v1925_v43 }
  0xb6   :  { %1894 = vmatpush1.bf16.xpose.msra.mxu0 %v2782_v59  ;;  %v1938_v59 = vpack.c.bf16 %v217_v33, %v213_v30  ;;  %p2166_p4 = pnand %p2165_p3, %p2159_p0 }
  0xb7   :  { %1897 = vmatprep.subr.msk.bf16.mxu0 %vm2386_vm4, %v2788_v18 }
  0xb8   :  { %2117 = vmatpush1.bf16.msra.mxu1 %v1928_v54 }
  0xb9   :  { %2120 = vmatprep.subr.msk.bf16.mxu1 %vm2386_vm4, %v1930_v56 }
  0xbc   :  { %2122 = vmatpush1.bf16.msra.mxu1 %v1933_v9 }
  0xbd   :  { %2125 = vmatprep.subr.msk.bf16.mxu1 %vm2386_vm4, %v1935_v60 }
  0xbe   :  { %1899 = vmatpush1.bf16.xpose.msra.mxu0 %v2803_v6 }
  0xbf   :  { %1902 = vmatprep.subr.msk.bf16.mxu0 %vm2386_vm4, %v2808_v52 }
  0xc0   :  { %2127 = vmatpush1.bf16.msra.mxu1 %v1938_v59 }
  0xc1   :  { %2130 = vmatprep.subr.msk.bf16.mxu1 %vm2386_vm4, %v2382_v50 }
  0xc3   :  { %1505 = vmatmul.mubr.f32.vlgmr.msra.gmra.mrb[4].mxu1 %v2656_v61 }
  0xc4   :  { %2132 = vmatpush1.bf16.msra.mxu1 %v2431_v0  ;;  %1575 = vmatprep.mubr.f32.mxu1 %v2207_v49 }
  0xc5   :  { %2135 = vmatprep.subr.msk.bf16.mxu1 %vm2386_vm4, %v2435_v2 }
  0xc6   :  { %1904 = vmatpush1.bf16.xpose.msra.mxu0 %v2823_v32 }
  0xc7   :  { %1907 = vmatprep.subr.msk.bf16.mxu0 %vm2386_vm4, %v2830_v35 }
  0xc8   :  { %2137 = vmatpush1.bf16.msra.mxu1 %v2484_v25 }
  0xc9   :  { %2140 = vmatprep.subr.msk.bf16.mxu1 %vm2489_vm6, %v2486_v28  ;;  %v2208_v28 = vmov -1.0  }
  0xca   :  { %944 = vst.msk [vmem:[#allocation3] sm:$0x7] %vm2981_vm7, %v2208_v28 }
  0xcc   :  { %2143 = vmatpush1.bf16.msk.msra.mxu1 %vm2342_vm2, %v2515_v42  ;;  %v1255_v42 = vunpack.c.0.s8 %v1254_v51 }
  0xce   :  { %1909 = vmatpush1.bf16.xpose.msra.mxu0 %v2845_v10 }
  0xcf   :  { %1576 = vmatmul.mubr.f32.vlgmr.msra.gmra.mrb[4].mxu1 %v2482_v24  ;;  %1912 = vmatprep.subr.msk.bf16.mxu0 %vm2386_vm4, %v2850_v11 }
  0xd6   :  { %1914 = vmatpush1.bf16.xpose.msra.mxu0 %v1913_v57 }
  0xd7   :  { %1917 = vmatprep.subr.msk.bf16.mxu0 %vm2386_vm4, %v1915_v21 }
  0xde   :  { %1919 = vmatpush1.bf16.xpose.msra.mxu0 %v1918_v20 }
  0xdf   :  { %1922 = vmatprep.subr.msk.bf16.mxu0 %vm2386_vm4, %v1920_v31 }
  0xe6   :  { %1924 = vmatpush1.bf16.xpose.msra.mxu0 %v1923_v41 }
  0xe7   :  { %1927 = vmatprep.subr.msk.bf16.mxu0 %vm2386_vm4, %v1925_v43 }
  0xee   :  { %1929 = vmatpush1.bf16.xpose.msra.mxu0 %v1928_v54 }
  0xef   :  { %1932 = vmatprep.subr.msk.bf16.mxu0 %vm2386_vm4, %v1930_v56 }
  0xf6   :  { %1934 = vmatpush1.bf16.xpose.msra.mxu0 %v1933_v9 }
  0xf7   :  { %1937 = vmatprep.subr.msk.bf16.mxu0 %vm2386_vm4, %v1935_v60 }
  0xfe   :  { %1939 = vmatpush1.bf16.xpose.msra.mxu0 %v1938_v59 }
 0x105   :  { %1103 = vmatmul.mubr.f32.vlgmr.msra.gmra.mrb[0].mxu0 %v2534_v55  ;;  %v1258_v55 = vsub.s32 %v1255_v42, %v2271_v13 }
 0x10a   :  { %v1245_v37 = vpop.f32.mrb[0].mxu1 }
 0x10b   :  { %v1247_v50 = vpop.f32.mrb[1].mxu1 }
 0x156   :  { %v1435_v0 = vpop.f32.mrb[2].mxu1 }
 0x157   :  { %v1437_v2 = vpop.f32.mrb[3].mxu1 }
 0x158   :  { %v1590_v24 = vcombine.low %v1435_v0, %v1437_v2 }
 0x15a   :  { %v1598_v47 = vrot.slane %v1590_v24, %v1258_v55 }
 0x1a2   :  { %v1577_v61 = vpop.f32.mrb[4].mxu1 }
 0x1a3   :  { %v1579_v49 = vpop.f32.mrb[5].mxu1 }
 0x1a4   :  { %v1591_v18 = vcombine.low %v1577_v61, %v1579_v49 }
 0x1a6   :  { %v1605_v6 = vrot.slane %v1591_v18, %v1258_v55 }
 0x1a8   :  { %v1606_v52 = vcombine.low %v1598_v47, %v1605_v6 }
 0x1aa   :  { %v1613_v8 = vrot.slane %v1606_v52, %v1258_v55 }
 0x1ac   :  { %1619 = vst.msk [vmem:[#allocation2] sm:$0xf] %vm1617_vm8, %v1613_v8 }
 0x1b3   :  { %v1665_v14 = vld [vmem:[#allocation2] sm:$0xf] }
 0x1b4   :  { %1668 = vst.msk [vmem:[#allocation5] sm:$0xf] %vm1617_vm8, %v1665_v14 }
 0x1b5   :  { %2169 = shalt.err (!%p2166_p4)
}
 0x1b6   :  { %s2170_s23 = scalar_lea.hbm %s3019_s4, 64 }
 0x1b7   :  { %p2171_p5 = scmp.ne.s32.totalorder %s3019_s4, %s2170_s23  ;;  %p2174_p6 = scmp.lt.u32.totalorder %s2170_s23, %s3019_s4 }
 0x1b9   :  { %p2176_p7 = pnand %p2174_p6, %p2171_p5 }
 0x1bb   :  { %2179 = shalt.err (!%p2176_p7)
}
 0x1bc   :  { %1696 = dma.vmem_to_hbm [thread:$0]  %s1694_s19, 64, %s3019_s4, [#allocation6]   ;;  %v1266_v22 = vrot.slane %v1245_v37, %v1258_v55  ;;  %v945_v7 = vld [vmem:[#allocation3] sm:$0x7] }
 0x1bd   :  { %s2211_s29 = smov [#allocation3]  }
 0x1be   :  { %s1679_s30 = sshll.u32 %s2211_s29, 4  ;;  %s1680_s30 = int_to_ptr.vmem [resolvable:$true] %s1679_s30 }
 0x1bf   :  { %s2180_s0 = scalar_lea.vmem %s1680_s30, 48  ;;  %s2184_s5 = scalar_lea.vmem %s1680_s30, 64 }
 0x1c0   :  { %p2181_p8 = scmp.ne.s32.totalorder %s1680_s30, %s2180_s0  ;;  %p2185_p9 = scmp.lt.s32.totalorder %s1680_s30, %s1680_s30 }
 0x1c1   :  { %p2186_p10 = scmp.lt.s32.totalorder %s2184_s5, %s2180_s0 }
 0x1c3   :  { %p2187_p11 = por %p2186_p10, %p2185_p9 }
 0x1c5   :  { %p2188_p12 = pnand %p2187_p11, %p2181_p8 }
 0x1d8   :  { %v1104_v3 = vpop.f32.mrb[0].mxu0 }
 0x1d9   :  { %v1106_v13 = vpop.f32.mrb[1].mxu0 }
 0x1da   :  { %v1252_v19 = vcombine.low %v1104_v3, %v1106_v13 }
 0x1dc   :  { %v1259_v32 = vrot.slane %v1252_v19, %v1258_v55 }
 0x1de   :  { %v1267_v35 = vcombine.low %v1259_v32, %v1266_v22 }
 0x1e0   :  { %v1274_v62 = vrot.slane %v1267_v35, %v1258_v55 }
 0x1e2   :  { %v1276_v1 = vadd.f32 %v1274_v62, %v945_v7 }
 0x1e4   :  { %1281 = vst.msk [vmem:[#allocation3] sm:$0x7] %vm2981_vm7, %v1276_v1 }
 0x1e5   :  { %2191 = shalt.err (!%p2188_p12)
}
 0x1e6   :  { %s2192_s7 = scalar_lea.hbm %s3018_s3, 48 }
 0x1e7   :  { %p2193_p13 = scmp.ne.s32.totalorder %s3018_s3, %s2192_s7  ;;  %p2196_p0 = scmp.lt.u32.totalorder %s2192_s7, %s3018_s3 }
 0x1e9   :  { %p2198_p1 = pnand %p2196_p0, %p2193_p13 }
 0x1eb   :  { %2201 = shalt.err (!%p2198_p1)
}
 0x1ec   :  { %1682 = dma.vmem_to_hbm [thread:$0]  %s1680_s30, 48, %s3018_s3, [#allocation4]  }
 0x1ed   :  { %2202 = dma.done.wait [#allocation4], 48  }
 0x1ee   :  { %2203 = vsyncadd [#allocation4], 4294967248 }
 0x1ef   :  { %2204 = dma.done.wait [#allocation6], 64  }
 0x1f0   :  { %2205 = vsyncadd [#allocation6], 4294967232 }
 0x1f1   :  { %1703 = vsyncpa [#allocation4], 1 }
 0x1f2   :  { %1704 = vsyncpa [#allocation6], 1 }

</bundles_post_ra>
